<compile_context>
chip_gen: v7x
topology: tpu7x:2x2x1
jax: 0.10.0
libtpu: 0.0.40
codegen_flags: <defaults>
</compile_context>

<pallas_src>
import jax
import jax.numpy as jnp
from jax import lax
from jax.experimental import pallas as pl
from jax.experimental.pallas import tpu as pltpu


_TARGET_BLOCK_BYTES = 8 * 1024 * 1024     # per input buffer (double-buffered)
_VMEM_LIMIT_BYTES = 40 * 1024 * 1024      # 2x8 MiB inputs + outputs + scratch


def _make_rowmax_kernel(L, tile_L, num_L_tiles, fill):
    """Row-wise max over the lane axis, accumulated across L-chunks."""
    needs_mask = (num_L_tiles > 1) and (L % tile_L != 0)

    def kernel(x_ref, o_ref):
        # x_ref: (tile_rows, tile_L)    o_ref: (1, 1, tile_rows)  [lane-dense]
        x = x_ref[...]
        if needs_mask:
            # Last L-chunk reads past column L: mask garbage before the max.
            k = pl.program_id(1)
            col = k * tile_L + lax.broadcasted_iota(jnp.int32, x.shape, 1)
            x = jnp.where(col < L, x, fill)
        part = jnp.max(x, axis=-1)                       # (tile_rows,)

        if num_L_tiles == 1:
            o_ref[0, 0, :] = part
        else:
            k = pl.program_id(1)

            @pl.when(k == 0)
            def _init():
                o_ref[0, 0, :] = part

            @pl.when(k != 0)
            def _accum():
                o_ref[0, 0, :] = jnp.maximum(o_ref[0, 0, :], part)

    return kernel


def _choose_tiles(R, L, itemsize, row_align):
    """Pick (tile_rows, tile_L) so each input block is ~_TARGET_BLOCK_BYTES,
    accounting for 128-lane padding of the reduction axis."""
    padded_rows = pl.cdiv(R, row_align) * row_align

    # Preferred: whole reduction axis in one block (grid only over rows).
    row_bytes = pl.cdiv(L, 128) * 128 * itemsize        # lane-padded footprint
    rows_fit = _TARGET_BLOCK_BYTES // row_bytes
    tile_rows = min((rows_fit // row_align) * row_align, padded_rows)
    if tile_rows >= row_align:
        return tile_rows, L

    # L too long for one block: tile the reduction axis as well.
    tile_rows = min(row_align * 8, padded_rows)
    cols_budget = max(128, _TARGET_BLOCK_BYTES // (tile_rows * itemsize))
    tile_L = (cols_budget // 128) * 128                 # 128-aligned chunks
    if tile_L >= L:
        tile_L = L
    return tile_rows, tile_L


def spatial_max_pool(x: jax.Array) -> jax.Array:
    """Global spatial max pool: (B, C, H, W) -> (B, C, 1, 1)."""
    B, C, H, W = x.shape
    R = B * C                 # independent rows to reduce
    L = H * W                 # reduction length (lane axis)
    x2 = x.reshape(R, L)      # free view for NCHW-contiguous input

    if L < 128:
        # Lane-padded layout would waste >2x VMEM and issue sub-512B strided
        # DMAs for these shapes -- keep them fused in XLA (review item 8).
        # TODO(synk): pack G spatial rows per 128-lane row + two-stage max.
        return jnp.max(x2, axis=-1).reshape(B, C, 1, 1)

    itemsize = jnp.dtype(x.dtype).itemsize
    row_align = max(8, 32 // itemsize)       # sublane packing: 8/16/32 rows

    tile_rows, tile_L = _choose_tiles(R, L, itemsize, row_align)
    num_row_tiles = pl.cdiv(R, tile_rows)
    num_L_tiles = pl.cdiv(L, tile_L)

    if jnp.issubdtype(x.dtype, jnp.floating):
        fill = float("-inf")
    else:
        fill = int(jnp.iinfo(x.dtype).min)

    kernel = _make_rowmax_kernel(L, tile_L, num_L_tiles, fill)

    out = pl.pallas_call(
        kernel,
        # Lane-dense output layout; block's last two dims == full array dims.
        out_shape=jax.ShapeDtypeStruct((num_row_tiles, 1, tile_rows), x.dtype),
        grid=(num_row_tiles, num_L_tiles),
        in_specs=[pl.BlockSpec((tile_rows, tile_L), lambda i, k: (i, k))],
        out_specs=pl.BlockSpec((1, 1, tile_rows), lambda i, k: (i, 0, 0)),
        compiler_params=pltpu.CompilerParams(
            # Rows are independent ("parallel"); the L axis accumulates into a
            # resident output block ("arbitrary").
            # NOTE(v7x): verify in a profile that "parallel" shards the row
            # axis across both TensorCores; if not, switch to CORE_PARALLEL.
            dimension_semantics=("parallel", "arbitrary"),
            vmem_limit_bytes=_VMEM_LIMIT_BYTES,
        ),
        cost_estimate=pl.CostEstimate(
            flops=R * L,                                   # one compare/elem
            bytes_accessed=R * L * itemsize + R * itemsize,
            transcendentals=0,
        ),
    )(x2)

    # Crop the padded rows of the last tile, then reshape like the torch module.
    return out.reshape(num_row_tiles * tile_rows)[:R].reshape(B, C, 1, 1)


if __name__ == "__main__":
    # Module has no learnable parameters; in_channels / batch_size are implied
    # by the input shape.
    B, C, H, W = 2, 4, 16, 16
    key = jax.random.PRNGKey(0)
    x = jax.random.normal(key, (B, C, H, W), dtype=jnp.float32)

    y = spatial_max_pool(x)
    jax.block_until_ready(y)

    # sanity check against pure-JAX reference (torch.max over W then H)
    ref = jnp.max(jnp.max(x, axis=-1), axis=-1).reshape(B, C, 1, 1)
    assert y.shape == (B, C, 1, 1)
    assert jnp.allclose(y, ref), "mismatch vs reference"

    print("KERNEL_OK")
</pallas_src>

<mosaic_0001>
module attributes {stable_mosaic.version = 11 : i64} {
  func.func @kernel(%arg0: i32, %arg1: i32, %arg2: memref<8x256xf32, #tpu.memory_space<vmem>>, %arg3: memref<1x1x8xf32, #tpu.memory_space<vmem>>) attributes {dimension_semantics = [#tpu.dimension_semantics<parallel>, #tpu.dimension_semantics<arbitrary>], iteration_bounds = array<i64: 1, 1>, scalar_prefetch = 0 : i64, scratch_operands = 0 : i64, tpu.core_type = #tpu.core_type<tc>, window_params = [{transform_indices = @transform_0, window_bounds = array<i64: 8, 256>}, {transform_indices = @transform_1, window_bounds = array<i64: 1, 1, 8>}]} {
    %c0 = arith.constant 0 : index
    %c0_0 = arith.constant 0 : index
    %0 = vector.load %arg2[%c0, %c0_0] : memref<8x256xf32, #tpu.memory_space<vmem>>, vector<8x256xf32>
    %cst = arith.constant dense<0xFF800000> : vector<8xf32>
    %1 = vector.multi_reduction <maximumf>, %0, %cst [1] : vector<8x256xf32> to vector<8xf32>
    %c0_1 = arith.constant 0 : index
    %c0_2 = arith.constant 0 : index
    %c0_3 = arith.constant 0 : index
    %2 = vector.load %arg3[%c0_1, %c0_2, %c0_3] : memref<1x1x8xf32, #tpu.memory_space<vmem>>, vector<1x1x8xf32>
    %3 = vector.shape_cast %2 : vector<1x1x8xf32> to vector<8xf32>
    %4 = vector.shape_cast %1 : vector<8xf32> to vector<1x1x8xf32>
    tpu.vector_store %arg3[%c0_1, %c0_2, %c0_3], %4 {strides = array<i32>} : memref<1x1x8xf32, #tpu.memory_space<vmem>>, vector<1x1x8xf32>,
    return
  }
  func.func @transform_0(%arg0: i32, %arg1: i32) -> (i32, i32) {
    %c0_i32 = arith.constant 0 : i32
    return %arg0, %arg1 : i32, i32
  }
  func.func @transform_1(%arg0: i32, %arg1: i32) -> (i32, i32, i32) {
    %c0_i32 = arith.constant 0 : i32
    %c0_i32_0 = arith.constant 0 : i32
    %c0_i32_1 = arith.constant 0 : i32
    return %arg0, %c0_i32, %c0_i32_0 : i32, i32, i32
  }
}

</mosaic_0001>

<bundles_post_ra>
// kernel: tpu_custom_call.1
= control target key start
LH: loop header
LB: loop body
LE: loop exit
PB: predicated region body
PF: predicated region fallthrough
CT: control target
= control target key end

     0   :  { %6 = vsyncpa [#allocation3], 0  ;;  %s137_s0 = inlined_call_operand.hbm [shape: f32[8,256], index: 0, kind: input, shape index: {}]   ;;  %s138_s1 = inlined_call_operand.hbm [shape: f32[1,1,8], index: 1, kind: output, shape index: {}]  }
   0x1   :  { %7 = vsyncpa [#allocation4], 0  ;;  %s101_s6 = smov [#allocation2]   ;;  %s53_s10 = scalar_lea.hbm %s137_s0, 256 }
   0x2   :  { %s14_s7 = sshll.u32 %s101_s6, 4  ;;  %p54_p0 = scmp.ne.s32.totalorder %s137_s0, %s53_s10  ;;  %s15_s7 = int_to_ptr.vmem [resolvable:$true] %s14_s7 }
   0x3   :  { %p57_p1 = scmp.lt.u32.totalorder %s53_s10, %s137_s0 }
   0x5   :  { %p59_p2 = pnand %p57_p1, %p54_p0 }
   0x7   :  { %62 = shalt.err (!%p59_p2)
}
   0x8   :  { %s63_s15 = scalar_lea.vmem %s15_s7, 256  ;;  %p68_p4 = scmp.lt.s32.totalorder %s15_s7, %s15_s7 }
   0x9   :  { %p64_p3 = scmp.ne.s32.totalorder %s15_s7, %s63_s15  ;;  %p69_p5 = scmp.lt.s32.totalorder %s63_s15, %s63_s15 }
   0xb   :  { %p70_p6 = por %p69_p5, %p68_p4 }
   0xd   :  { %p71_p7 = pnand %p70_p6, %p64_p3 }
   0xf   :  { %74 = shalt.err (!%p71_p7)
}
  0x10   :  { %17 = dma.hbm_to_vmem [thread:$0]  %s137_s0, 256, %s15_s7, [#allocation3]  }
  0x11   :  { %97 = dma.done.wait [#allocation3], 256  }
  0x12   :  { %98 = vsyncadd [#allocation3], 4294967040  ;;  %v21_v0 = vld [vmem:[#allocation2] sm:$0xff]  ;;  %v22_v1 = vld [vmem:[#allocation2 + $0x8] sm:$0xff]  ;;  %v27_v3 = vlaneseq  ;;  %s102_s18 = smov [#allocation5]   ;;  %vm34_vm0 = vcmask 57344  }
  0x13   :  { %v23_v2 = vmax.f32 %v21_v0, %v22_v1  ;;  %s42_s19 = sshll.u32 %s102_s18, 4  ;;  %s43_s19 = int_to_ptr.vmem [resolvable:$true] %s42_s19 }
  0x14   :  { %v28_v4 = vand.u32 127, %v27_v3  ;;  %v30_v5 = vshrl.u32 %v27_v3, 7  ;;  %s75_s20 = scalar_lea.vmem %s43_s19, 16  ;;  %s79_s0 = scalar_lea.vmem %s43_s19, 32 }
  0x15   :  { %24 = vmax.xlane.f32.xlu0 %v23_v2  ;;  %p76_p8 = scmp.ne.s32.totalorder %s43_s19, %s75_s20  ;;  %p80_p9 = scmp.lt.s32.totalorder %s43_s19, %s43_s19 }
  0x16   :  { %v31_v6 = vsub.s32 %v28_v4, %v30_v5  ;;  %p81_p10 = scmp.lt.s32.totalorder %s79_s0, %s75_s20 }
  0x18   :  { %p82_p11 = por %p81_p10, %p80_p9 }
  0x1a   :  { %p83_p12 = pnand %p82_p11, %p76_p8 }
  0xa2   :  { %v25_v7 = vpop.xlane.xlu0 %24 }
  0xa3   :  { %v32_v8 = vrot.slane %v25_v7, %v31_v6 }
  0xa5   :  { %35 = vst.msk [vmem:[#allocation5] sm:$0x1] %vm34_vm0, %v32_v8 }
  0xa6   :  { %86 = shalt.err (!%p83_p12)
}
  0xa7   :  { %s87_s23 = scalar_lea.hbm %s138_s1, 16 }
  0xa8   :  { %p88_p13 = scmp.ne.s32.totalorder %s138_s1, %s87_s23  ;;  %p91_p0 = scmp.lt.u32.totalorder %s87_s23, %s138_s1 }
  0xaa   :  { %p93_p1 = pnand %p91_p0, %p88_p13 }
  0xac   :  { %96 = shalt.err (!%p93_p1)
}
  0xad   :  { %45 = dma.vmem_to_hbm [thread:$0]  %s43_s19, 16, %s138_s1, [#allocation4]  }
  0xae   :  { %99 = dma.done.wait [#allocation4], 16  }
  0xaf   :  { %100 = vsyncadd [#allocation4], 4294967280 }
  0xb0   :  { %49 = vsyncpa [#allocation3], 1 }
  0xb1   :  { %50 = vsyncpa [#allocation4], 1 }

</bundles_post_ra>
